<compile_context>
chip_gen: v7x
topology: tpu7x:2x2x1
jax: 0.10.0
libtpu: 0.0.40
codegen_flags: <defaults>
</compile_context>

<pallas_src>
import functools

import jax
import jax.numpy as jnp
from jax.experimental import pallas as pl
from jax.experimental.pallas import tpu as pltpu


def _ada_group_norm_kernel(same_group_ref, scale_ref, shift_ref, x_ref, o_ref,
                           *, inv_n: float, eps: float):
    """One (batch, channel-block) tile.

    same_group_ref : (Cb, Cb)  f32 indicator; [i, j] = 1 iff channels i, j share a group
    scale_ref      : (Cb, 1)   per-channel scale column for this batch element
    shift_ref      : (Cb, 1)   per-channel shift column for this batch element
    x_ref          : (Cb, HWp) input channel block (H*W zero-padded to a lane multiple)
    o_ref          : (Cb, HWp) output channel block
    """
    x = x_ref[...].astype(jnp.float32)                       # (Cb, HWp)

    # Per-channel first / second moments (zero padding contributes nothing).
    row_sum = jnp.sum(x, axis=-1, keepdims=True)             # (Cb, 1)
    row_sq = jnp.sum(x * x, axis=-1, keepdims=True)          # (Cb, 1)

    # Gather per-group sums and broadcast back per channel on the MXU using
    # the resident indicator (two tiny Nx1 matmuls; negligible vs the x stream).
    sg = same_group_ref[...]
    mean_c = jnp.dot(sg, row_sum, preferred_element_type=jnp.float32) * inv_n
    msq_c = jnp.dot(sg, row_sq, preferred_element_type=jnp.float32) * inv_n
    # One-pass E[x^2]-mean^2 (clamped) — matches fused group_norm; fine for
    # normally-scaled activations.  Switch to a two-pass form if inputs have
    # |mean| >> std.
    var_c = jnp.maximum(msq_c - mean_c * mean_c, 0.0)
    rstd_c = jax.lax.rsqrt(var_c + eps)                       # (Cb, 1)

    # Fused normalize + modulate: out = x * a + b  (single pass over x).
    a_c = rstd_c * (1.0 + scale_ref[...].astype(jnp.float32))
    b_c = shift_ref[...].astype(jnp.float32) - mean_c * a_c
    o_ref[...] = (x * a_c + b_c).astype(o_ref.dtype)


def _vmem_capacity_bytes():
    try:
        return int(pltpu.get_tpu_info().vmem_capacity_bytes)
    except Exception:
        return 64 << 20  # conservative fallback (v7x physical VMEM per TensorCore)


def _sublane_multiple(dtype):
    # Second-to-last block dim must be a multiple of (32 // itemsize) sublanes
    # (8 for f32, 16 for bf16, 32 for int8) unless it spans the whole axis.
    return max(8, 32 // jnp.dtype(dtype).itemsize)


def _pick_channel_block(C, G, HW, sublane_mult, bytes_per_row_elem, budget_bytes):
    """Largest channel block that (a) holds whole groups, (b) is sublane-legal
    for the input dtype, and (c) keeps the per-step VMEM footprint in budget."""
    cpg = C // G
    best = None
    for k in range(1, G + 1):
        if G % k:
            continue
        c_blk = k * cpg
        if c_blk % sublane_mult != 0 and c_blk != C:
            continue
        if best is None:
            best = c_blk                       # smallest legal block as a fallback
        if c_blk * HW * bytes_per_row_elem <= budget_bytes:
            best = c_blk                       # keep the largest block that fits
    return best if best is not None else C


def ada_group_norm(x, emb, weight, bias, *, num_groups, eps=1e-5, act_fn=None):
    """AdaGroupNorm forward.

    x:      [B, C, H, W]
    emb:    [B, E]
    weight: [2*C, E]   (PyTorch nn.Linear layout: [out_features, in_features])
    bias:   [2*C]
    """
    if act_fn not in (None, "silu", "swish", "mish", "gelu", "relu"):
        raise ValueError(f"unsupported act_fn: {act_fn}")
    B, C, H, W = x.shape
    G = num_groups
    if C % G != 0:
        raise ValueError("channels must be divisible by num_groups")
    HW = H * W
    cpg = C // G

    # ---- timestep-embedding projection: tiny GEMM hoisted out of the kernel ----
    e = emb.astype(jnp.float32)
    if act_fn in ("silu", "swish"):
        e = jax.nn.silu(e)
    elif act_fn == "mish":
        e = e * jnp.tanh(jax.nn.softplus(e))
    elif act_fn == "gelu":
        e = jax.nn.gelu(e, approximate=False)
    elif act_fn == "relu":
        e = jax.nn.relu(e)
    proj = e @ weight.astype(jnp.float32).T + bias.astype(jnp.float32)   # (B, 2C)
    scale3 = proj[:, :C].reshape(B, C, 1)
    shift3 = proj[:, C:].reshape(B, C, 1)

    # ---- lane-dense spatial layout (pad H*W up to a multiple of 128 if needed) ----
    HW_pad = HW if HW % 128 == 0 else (-(-HW // 128)) * 128
    x3 = x.reshape(B, C, HW)
    if HW_pad != HW:
        # Zero padding leaves the group sums untouched; inv_n uses the true HW.
        x3 = jnp.pad(x3, ((0, 0), (0, 0), (0, HW_pad - HW)))

    # ---- generation-aware tile sizing / VMEM budget ----
    itemsize = jnp.dtype(x.dtype).itemsize
    cap = _vmem_capacity_bytes()
    budget = int(0.75 * cap)                 # ~48 MiB on v7x, ~96 MiB on v5e/v6e
    # Per channel-row element: in+out double-buffered at input dtype + ~3 f32 temps.
    bytes_per_row_elem = 4 * itemsize + 12
    c_blk = _pick_channel_block(C, G, HW_pad, _sublane_multiple(x.dtype),
                                bytes_per_row_elem, budget)
    n_cblk = C // c_blk
    inv_n = 1.0 / float(cpg * HW)

    est_usage = c_blk * HW_pad * bytes_per_row_elem + (2 << 20)
    vmem_limit = int(min(int(0.9 * cap), max(budget, est_usage)))

    # Same-group indicator: identical for every block since blocks hold whole groups.
    gid = jnp.arange(c_blk, dtype=jnp.int32) // cpg
    same_group = (gid[:, None] == gid[None, :]).astype(jnp.float32)

    kernel = functools.partial(_ada_group_norm_kernel, inv_n=inv_n, eps=float(eps))

    cost = pl.CostEstimate(
        flops=int(6 * B * C * HW_pad + 4 * B * C * c_blk),
        transcendentals=int(B * C),
        bytes_accessed=int(2 * B * C * HW_pad * itemsize
                           + 2 * B * C * 4           # scale + shift columns
                           + c_blk * c_blk * 4),     # indicator, loaded once
    )

    out3 = pl.pallas_call(
        kernel,
        out_shape=jax.ShapeDtypeStruct((B, C, HW_pad), x.dtype),
        grid_spec=pltpu.PrefetchScalarGridSpec(
            num_scalar_prefetch=0,
            grid=(B, n_cblk),
            in_specs=[
                pl.BlockSpec((c_blk, c_blk), lambda b, j: (0, 0)),            # indicator (resident)
                pl.BlockSpec((None, c_blk, 1), lambda b, j: (b, j, 0)),       # scale column
                pl.BlockSpec((None, c_blk, 1), lambda b, j: (b, j, 0)),       # shift column
                pl.BlockSpec((None, c_blk, HW_pad), lambda b, j: (b, j, 0)),  # x tile
            ],
            out_specs=pl.BlockSpec((None, c_blk, HW_pad), lambda b, j: (b, j, 0)),
        ),
        compiler_params=pltpu.CompilerParams(
            dimension_semantics=("parallel", "parallel"),
            vmem_limit_bytes=vmem_limit,
        ),
        cost_estimate=cost,
    )(same_group, scale3, shift3, x3)

    if HW_pad != HW:
        out3 = out3[:, :, :HW]
    return out3.reshape(B, C, H, W)


if __name__ == "__main__":
    # AdaGroupNorm(embedding_dim=32, out_dim=8, num_groups=2, act_fn="silu")
    B, C, H, W = 2, 8, 16, 16
    E = 32
    G = 2
    eps = 1e-5
    act_fn = "silu"

    key = jax.random.PRNGKey(0)
    kx, ke, kw, kb = jax.random.split(key, 4)
    x = jax.random.normal(kx, (B, C, H, W), jnp.float32)
    emb = jax.random.normal(ke, (B, E), jnp.float32)
    bound = 1.0 / jnp.sqrt(E)
    weight = jax.random.uniform(kw, (2 * C, E), jnp.float32, -bound, bound)
    bias = jax.random.uniform(kb, (2 * C,), jnp.float32, -bound, bound)

    out = ada_group_norm(x, emb, weight, bias, num_groups=G, eps=eps, act_fn=act_fn)
    jax.block_until_ready(out)

    # Pure-JAX reference matching the PyTorch module semantics.
    e_act = jax.nn.silu(emb)
    proj = e_act @ weight.T + bias                       # [B, 2C]
    scale = proj[:, :C][:, :, None, None]
    shift = proj[:, C:][:, :, None, None]
    xg = x.reshape(B, G, -1)
    mean = xg.mean(-1, keepdims=True)
    var = xg.var(-1, keepdims=True)
    xn = ((xg - mean) * jax.lax.rsqrt(var + eps)).reshape(B, C, H, W)
    ref = xn * (1.0 + scale) + shift

    assert jnp.allclose(out, ref, atol=1e-4, rtol=1e-4), float(jnp.max(jnp.abs(out - ref)))
    print("KERNEL_OK")
</pallas_src>

<mosaic_0001>
module attributes {stable_mosaic.version = 11 : i64} {
  func.func @_ada_group_norm_kernel(%arg0: i32, %arg1: i32, %arg2: memref<8x8xf32, #tpu.memory_space<vmem>>, %arg3: memref<1x8x1xf32, #tpu.memory_space<vmem>>, %arg4: memref<1x8x1xf32, #tpu.memory_space<vmem>>, %arg5: memref<1x8x256xf32, #tpu.memory_space<vmem>>, %arg6: memref<1x8x256xf32, #tpu.memory_space<vmem>>) attributes {dimension_semantics = [#tpu.dimension_semantics<parallel>, #tpu.dimension_semantics<parallel>], iteration_bounds = array<i64: 2, 1>, scalar_prefetch = 0 : i64, scratch_operands = 0 : i64, tpu.core_type = #tpu.core_type<tc>, window_params = [{pipeline_mode = #tpu.pipeline_mode<synchronous>, transform_indices = @transform_0, window_bounds = array<i64: 8, 8>}, {transform_indices = @transform_1, window_bounds = array<i64: 1, 8, 1>}, {transform_indices = @transform_2, window_bounds = array<i64: 1, 8, 1>}, {transform_indices = @transform_3, window_bounds = array<i64: 1, 8, 256>}, {transform_indices = @transform_4, window_bounds = array<i64: 1, 8, 256>}]} {
    %c0 = arith.constant 0 : index
    %c0_0 = arith.constant 0 : index
    %c0_1 = arith.constant 0 : index
    %0 = vector.load %arg5[%c0, %c0_0, %c0_1] : memref<1x8x256xf32, #tpu.memory_space<vmem>>, vector<1x8x256xf32>
    %1 = vector.shape_cast %0 : vector<1x8x256xf32> to vector<8x256xf32>
    %cst = arith.constant dense<0.000000e+00> : vector<8xf32>
    %2 = vector.multi_reduction <add>, %1, %cst [1] : vector<8x256xf32> to vector<8xf32>
    %3 = vector.shape_cast %2 : vector<8xf32> to vector<8x1xf32>
    %4 = arith.mulf %1, %1 : vector<8x256xf32>
    %cst_2 = arith.constant dense<0.000000e+00> : vector<8xf32>
    %5 = vector.multi_reduction <add>, %4, %cst_2 [1] : vector<8x256xf32> to vector<8xf32>
    %6 = vector.shape_cast %5 : vector<8xf32> to vector<8x1xf32>
    %c0_3 = arith.constant 0 : index
    %c0_4 = arith.constant 0 : index
    %7 = vector.load %arg2[%c0_3, %c0_4] : memref<8x8xf32, #tpu.memory_space<vmem>>, vector<8x8xf32>
    %cst_5 = arith.constant dense<0.000000e+00> : vector<8x1xf32>
    %8 = tpu.matmul %7, %3, %cst_5 {dimension_numbers = #tpu.dot_dimension_numbers<[1], [0], [0], [1], [0, 0, 1, 1], [], []>} : vector<8x8xf32>, vector<8x1xf32>, vector<8x1xf32> -> vector<8x1xf32>
    %cst_6 = arith.constant 9.765625E-4 : f32
    %9 = vector.broadcast %cst_6 : f32 to vector<8x1xf32>
    %10 = arith.mulf %8, %9 : vector<8x1xf32>
    %cst_7 = arith.constant dense<0.000000e+00> : vector<8x1xf32>
    %11 = tpu.matmul %7, %6, %cst_7 {dimension_numbers = #tpu.dot_dimension_numbers<[1], [0], [0], [1], [0, 0, 1, 1], [], []>} : vector<8x8xf32>, vector<8x1xf32>, vector<8x1xf32> -> vector<8x1xf32>
    %cst_8 = arith.constant 9.765625E-4 : f32
    %12 = vector.broadcast %cst_8 : f32 to vector<8x1xf32>
    %13 = arith.mulf %11, %12 : vector<8x1xf32>
    %14 = arith.mulf %10, %10 : vector<8x1xf32>
    %15 = arith.subf %13, %14 : vector<8x1xf32>
    %cst_9 = arith.constant 0.000000e+00 : f32
    %16 = vector.broadcast %cst_9 : f32 to vector<8x1xf32>
    %17 = arith.maximumf %15, %16 : vector<8x1xf32>
    %cst_10 = arith.constant 9.99999974E-6 : f32
    %18 = vector.broadcast %cst_10 : f32 to vector<8x1xf32>
    %19 = arith.addf %17, %18 : vector<8x1xf32>
    %20 = math.rsqrt %19 : vector<8x1xf32>
    %c0_11 = arith.constant 0 : index
    %c0_12 = arith.constant 0 : index
    %c0_13 = arith.constant 0 : index
    %21 = vector.load %arg3[%c0_11, %c0_12, %c0_13] : memref<1x8x1xf32, #tpu.memory_space<vmem>>, vector<1x8x1xf32>
    %22 = vector.shape_cast %21 : vector<1x8x1xf32> to vector<8x1xf32>
    %cst_14 = arith.constant 1.000000e+00 : f32
    %23 = vector.broadcast %cst_14 : f32 to vector<8x1xf32>
    %24 = arith.addf %23, %22 : vector<8x1xf32>
    %25 = arith.mulf %20, %24 : vector<8x1xf32>
    %c0_15 = arith.constant 0 : index
    %c0_16 = arith.constant 0 : index
    %c0_17 = arith.constant 0 : index
    %26 = vector.load %arg4[%c0_15, %c0_16, %c0_17] : memref<1x8x1xf32, #tpu.memory_space<vmem>>, vector<1x8x1xf32>
    %27 = vector.shape_cast %26 : vector<1x8x1xf32> to vector<8x1xf32>
    %28 = arith.mulf %10, %25 : vector<8x1xf32>
    %29 = arith.subf %27, %28 : vector<8x1xf32>
    %30 = vector.broadcast %25 : vector<8x1xf32> to vector<8x256xf32>
    %31 = arith.mulf %1, %30 : vector<8x256xf32>
    %32 = vector.broadcast %29 : vector<8x1xf32> to vector<8x256xf32>
    %33 = arith.addf %31, %32 : vector<8x256xf32>
    %c0_18 = arith.constant 0 : index
    %c0_19 = arith.constant 0 : index
    %c0_20 = arith.constant 0 : index
    %34 = vector.load %arg6[%c0_18, %c0_19, %c0_20] : memref<1x8x256xf32, #tpu.memory_space<vmem>>, vector<1x8x256xf32>
    %35 = vector.shape_cast %34 : vector<1x8x256xf32> to vector<8x256xf32>
    %36 = vector.shape_cast %33 : vector<8x256xf32> to vector<1x8x256xf32>
    tpu.vector_store %arg6[%c0_18, %c0_19, %c0_20], %36 {strides = array<i32>} : memref<1x8x256xf32, #tpu.memory_space<vmem>>, vector<1x8x256xf32>,
    return
  }
  func.func @transform_0(%arg0: i32, %arg1: i32) -> (i32, i32) {
    %c0_i32 = arith.constant 0 : i32
    %c0_i32_0 = arith.constant 0 : i32
    %c0_i32_1 = arith.constant 0 : i32
    return %c0_i32, %c0_i32_0 : i32, i32
  }
  func.func @transform_1(%arg0: i32, %arg1: i32) -> (i32, i32, i32) {
    %c0_i32 = arith.constant 0 : i32
    %c0_i32_0 = arith.constant 0 : i32
    return %arg0, %arg1, %c0_i32 : i32, i32, i32
  }
  func.func @transform_2(%arg0: i32, %arg1: i32) -> (i32, i32, i32) {
    %c0_i32 = arith.constant 0 : i32
    %c0_i32_0 = arith.constant 0 : i32
    return %arg0, %arg1, %c0_i32 : i32, i32, i32
  }
  func.func @transform_3(%arg0: i32, %arg1: i32) -> (i32, i32, i32) {
    %c0_i32 = arith.constant 0 : i32
    %c0_i32_0 = arith.constant 0 : i32
    return %arg0, %arg1, %c0_i32 : i32, i32, i32
  }
  func.func @transform_4(%arg0: i32, %arg1: i32) -> (i32, i32, i32) {
    %c0_i32 = arith.constant 0 : i32
    %c0_i32_0 = arith.constant 0 : i32
    return %arg0, %arg1, %c0_i32 : i32, i32, i32
  }
}

</mosaic_0001>

<bundles_post_ra>
// kernel: tpu_custom_call.1
= control target key start
LH: loop header
LB: loop body
LE: loop exit
PB: predicated region body
PF: predicated region fallthrough
CT: control target
= control target key end

     0   :  { %9 = vsyncpa [#allocation3], 0  ;;  %s919_s0 = inlined_call_operand.vmem [shape: f32[8,8], index: 0, kind: input, shape index: {}]   ;;  %s920_s1 = inlined_call_operand.vmem [shape: f32[2,8,1], index: 1, kind: input, shape index: {}]   ;;  %s921_s2 = inlined_call_operand.vmem [shape: f32[2,8,1], index: 2, kind: input, shape index: {}]   ;;  %s922_s3 = inlined_call_operand.vmem [shape: f32[2,8,256], index: 3, kind: input, shape index: {}]   ;;  %s923_s4 = inlined_call_operand.hbm [shape: f32[2,8,256], index: 4, kind: output, shape index: {}]  }
   0x1   :  { %11 = vsyncpa [#allocation3 + $0x1], 0  ;;  %s794_s15 = smov 0   ;;  %s796_s16 = smov 0  }
   0x2   :  { %s798_s17 = smov 0   ;;  %s800_s18 = smov 0  }
   0x3   :  { %s802_s19 = smov 0   ;;  %s804_s20 = smov 0  }
   0x4 LB: > { %s590_s21 = sadd.s32 4294967295, %s763_s20   ;;  %s591_s22 = sadd.s32 4294967294, %s763_s20   ;;  %s763_s20 = sphi %s804_s20, %s17_s20   ;;  %s759_s19 = sphi %s802_s19, %s930_s19   ;;  %s755_s18 = sphi %s800_s18, %s929_s18   ;;  %s751_s17 = sphi %s798_s17, %s928_s17   ;;  %s747_s16 = sphi %s796_s16, %s927_s16   ;;  %s743_s15 = sphi %s794_s15, %s926_s15  }
   0x5   : > { %s29_s23 = sadd.s32 1, %s759_s19  ;;  %s143_s24 = sadd.s32 1, %s751_s17 }
   0x6   : > { %p31_p0 = scmp.ge.s32.totalorder %s29_s23, 2  ;;  %p153_p1 = scmp.ne.s32.totalorder %s751_s17, %s747_s16 }
   0x7   : > { %p154_p2 = scmp.eq.s32.totalorder %s590_s21, 1  ;;  %p159_p3 = scmp.ne.s32.totalorder %s747_s16, %s743_s15 }
   0x8   : > { %s932_s23 = smov (%p31_p0, %s29_s23), 0  ;;  %p160_p5 = scmp.eq.s32.totalorder %s591_s22, 1 }
   0x9   : > { %p834_p4 = por %p154_p2, %p153_p1  ;;  %s138_s26 = ssub.s32 %s759_s19, %s932_s23 }
   0xa   : > { %p594_p6 = scmp.ge.s32.totalorder %s763_s20, 1  ;;  %p141_p7 = scmp.eq.s32.totalorder %s138_s26, 0 }
   0xb   : > { %p841_p8 = por %p160_p5, %p159_p3  ;;  %p213_p9 = scmp.lt.s32.totalorder %s763_s20, 3 }
   0xc   : > { %s847_s28 = scalar_select %p141_p7, %s751_s17, %s143_s24  }
   0xd   : > { %p214_p10 = pnand %p594_p6, %p213_p9 }
   0xe   : > { %p257_p11 = scmp.lt.s32.totalorder (!%p214_p10), %s755_s18, 1  ;;  %v765_v0 = vmov (!%p214_p10), 0.0   ;;  %vm766_vm0 = vmmov (!%p214_p10), 0   ;;  %v290_v7 = vld [vmem:[%s919_s0] sm:$0xff] (!%p214_p10)  ;;  %vm291_vm1 = vcmask (!%p214_p10), 64512   ;;  %v767_v10 = vmov (!%p214_p10), 0  }
   0xf   : > { %217 = sbr.rel (%p214_p10) target bundleno = 557 (0x22d), region = 36  ;;  %613 = vmatprep.subr.mxu0 (!%p214_p10), %v765_v0  ;;  %618 = vmatprep.subr.mxu1 (!%p214_p10), %v765_v0  ;;  %s254_s24 = sand.u32 (!%p214_p10), 1, %s747_s16  }
  0x10   : > { %615 = vmatprep.mubr.msk.f32.mxu0 (!%p214_p10), %vm766_vm0, %v765_v0  ;;  %620 = vmatprep.mubr.msk.f32.mxu1 (!%p214_p10), %vm766_vm0, %v765_v0  ;;  %s595_s26 = sshll.u32 (!%p214_p10), %s254_s24, 4 }
  0x11   : > { %681 = vset.pattern.permute.xlu1 (!%p214_p10), %v767_v10  ;;  %682 = vset.pattern.permute.xlu0 (!%p214_p10), %v767_v10 }
  0x16   : > { %s851_s29 = scalar_select %p257_p11, %s755_s18, 1 }
  0x18   : > { %s607_s30 = sshll.u32 %s851_s29, 4  ;;  %s596_s10 = sshll.u32 %s851_s29, 3 }
  0x19   : > { %s279_s7 = scalar_lea.vmem %s922_s3, %s607_s30  ;;  %s263_s13 = scalar_lea.vmem %s920_s1, %s596_s10 }
  0x1a   : > { %v280_v1 = vld [vmem:[%s279_s7] sm:$0xff]  ;;  %v281_v2 = vld [vmem:[%s279_s7 + $0x8] sm:$0xff]  ;;  %s270_s22 = scalar_lea.vmem %s921_s2, %s596_s10  ;;  %s608_s29 = sshll.u32 %s755_s18, 8 }
  0x1b   : > { %v282_v3 = vadd.f32 %v281_v2, %v280_v1  ;;  %v285_v4 = vmul.f32 %v280_v1, %v280_v1  ;;  %v286_v5 = vmul.f32 %v281_v2, %v281_v2  ;;  %v442_v21 = vld [vmem:[%s263_s13] sm:$0xff]  ;;  %s256_s30 = scalar_lea.vmem [#allocation2], %s595_s26  ;;  %s872_s8 = scalar_lea.hbm %s923_s4, %s608_s29 }
  0x1c   : > { %v443_v22 = vadd.f32 1.0, %v442_v21  ;;  %v445_v25 = vld [vmem:[%s270_s22] sm:$0xff]  ;;  %s481_s5 = sshll.u32 %s256_s30, 4  ;;  %s465_s18 = scalar_lea.sflag [#allocation3], %s254_s24  ;;  %s874_s5 = int_to_ptr.vmem [resolvable:$true] %s481_s5 }
  0x1d   : > { %283 = vadd.xlane.f32.xlu0 %v282_v3  ;;  %v287_v6 = vadd.f32 %v286_v5, %v285_v4  ;;  %s685_s9 = scalar_lea.vmem %s874_s5, 256  ;;  %s768_s10 = smov [#allocation2]  }
  0x1e   : > { %p686_p12 = scmp.ne.s32.totalorder %s874_s5, %s685_s9  ;;  %s689_s11 = sshll.u32 %s768_s10, 4  ;;  %s690_s11 = int_to_ptr.vmem [resolvable:$false] %s689_s11 }
  0x1f   : > { %s691_s12 = scalar_lea.vmem %s690_s11, 512  ;;  %p692_p1 = scmp.lt.s32.totalorder %s874_s5, %s690_s11 }
  0x20   : > { %p687_p13 = pnand %p686_p12, %p834_p4  ;;  %p693_p2 = scmp.lt.s32.totalorder %s691_s12, %s685_s9 }
  0x21   : > { %288 = vadd.xlane.f32.xlu0 %v287_v6 }
  0x22   : > { %p688_p0 = pneg %p687_p13  ;;  %p694_p3 = por %p693_p2, %p692_p1 }
  0x24   : > { %p695_p5 = pnand %p694_p3, %p688_p0 }
  0xaa   : > { %v284_v8 = vpop.xlane.xlu0 %283 }
  0xab   : > { %614 = vmatpush3.msra.mxu0 %v284_v8 }
  0xac   : > { %616 = vmatmul.mubr.msk.f32.vlgmr.msra.gmra.mrb[0].mxu0 %vm291_vm1, %v290_v7 }
  0xae   : > { %v289_v9 = vpop.xlane.xlu0 %288 }
  0xaf   : > { %619 = vmatpush3.msra.mxu1 %v289_v9 }
  0xb0   : > { %621 = vmatmul.mubr.msk.f32.vlgmr.msra.gmra.mrb[0].mxu1 %vm291_vm1, %v290_v7 }
 0x17f   : > { %v361_v11 = vpop.f32.mrb[0].mxu0 }
 0x180   : > { %v365_v12 = vmul.f32 0.0009765625, %v361_v11  ;;  %v617_v13 = vpop.f32.mrb[1].mxu0 }
 0x182   : > { %v437_v14 = vmul.f32 %v365_v12, %v365_v12 }
 0x183   : > { %v432_v15 = vpop.f32.mrb[0].mxu1 }
 0x184   : > { %v436_v16 = vmul.f32 0.0009765625, %v432_v15  ;;  %v622_v17 = vpop.f32.mrb[1].mxu1 }
 0x186   : > { %v438_v18 = vsub.f32 %v436_v16, %v437_v14 }
 0x188   : > { %v439_v19 = vmax.f32 %v438_v18, 0.0 }
 0x18a   : > { %v440_v20 = vadd.f32 1e-05, %v439_v19 }
 0x18c   : > { %683 = vrsqrt.f32 %v440_v20 }
 0x196   : > { %v684_v23 = vpop.eup %683 }
 0x197   : > { %v444_v24 = vmul.f32 %v684_v23, %v443_v22 }
 0x199   : > { %450 = vperm.xlu1 %681, %v444_v24   ;;  %v446_v26 = vmul.f32 %v444_v24, %v365_v12 }
 0x19b   : > { %v447_v27 = vsub.f32 %v445_v25, %v446_v26 }
 0x19d   : > { %457 = vperm.xlu1 %681, %v447_v27  }
 0x218   : > { %v451_v28 = vpop.permute.xlu1 %450 }
 0x219   : > { %v453_v29 = vmul.f32 %v451_v28, %v280_v1  ;;  %v454_v30 = vmul.f32 %v451_v28, %v281_v2 }
 0x21c   : > { %v458_v31 = vpop.permute.xlu1 %457 }
 0x21d   : > { %v460_v32 = vadd.f32 %v458_v31, %v453_v29  ;;  %v461_v33 = vadd.f32 %v458_v31, %v454_v30 }
 0x21f   : > { %462 = vst [vmem:[%s256_s30] sm:$0xff] %v460_v32  ;;  %463 = vst [vmem:[%s256_s30 + $0x8] sm:$0xff] %v461_v33 }
 0x220   : > { %698 = shalt.err (!%p695_p5)
}
 0x221   : > { %s699_s13 = scalar_lea.hbm %s872_s8, 256  ;;  %s703_s22 = scalar_lea.hbm %s923_s4, 512 }
 0x222   : > { %p700_p6 = scmp.ne.s32.totalorder %s872_s8, %s699_s13  ;;  %p704_p10 = scmp.lt.u32.totalorder %s872_s8, %s923_s4 }
 0x223   : > { %p705_p11 = scmp.lt.u32.totalorder %s703_s22, %s699_s13  ;;  %p707_p13 = scmp.lt.u32.totalorder %s699_s13, %s872_s8 }
 0x224   : > { %p701_p7 = pnand %p700_p6, %p834_p4 }
 0x225   : > { %p706_p12 = por %p705_p11, %p704_p10 }
 0x226   : > { %p702_p9 = pneg %p701_p7 }
 0x227   : > { %p708_p0 = por %p707_p13, %p706_p12 }
 0x229   : > { %p709_p1 = pnand %p708_p0, %p702_p9 }
 0x22b   : > { %712 = shalt.err (!%p709_p1)
}
 0x22c   : > { %623 = dma.vmem_to_hbm [thread:$0]  (%p834_p4), %s874_s5, 256, %s872_s8, %s465_s18  }
 0x22d PF: > { %p629_p2 = scmp.ge.s32.totalorder %s763_s20, 2  ;;  %s493_s29 = sand.u32 1, %s743_s15  }
 0x22e   : > { %s494_s30 = scalar_lea.sflag [#allocation3], %s493_s29 }
 0x22f   : > { %p626_p3 = pnand %p629_p2, %p841_p8 }
 0x231   : > { %738 = dma.done.wait (!%p626_p3), %s494_s30, 256  }
 0x232   : > { %740 = vsyncadd (!%p626_p3), %s494_s30, 4294967040  ;;  %s17_s20 = sadd.s32 1, %s763_s20   ;;  %s926_s15 = smov %s747_s16 }
 0x233   : > { %p14_p5 = scmp.ge.s32.totalorder %s17_s20, 4   ;;  %s927_s16 = smov %s751_s17 }
 0x234   : > { %s928_s17 = smov %s847_s28  ;;  %s929_s18 = smov %s759_s19 }
 0x235   : > { %s930_s19 = smov %s932_s23  ;;  %16 = sbr.rel (!%p14_p5) target bundleno = 4 (0x4), region = 77 }
 0x23c   :  { %499 = vsyncpa [#allocation3], 1 }
 0x23d   :  { %501 = vsyncpa [#allocation3 + $0x1], 1 }

</bundles_post_ra>
